<compile_context>
chip_gen: v5e
topology: v5e:2x2
jax: 0.10.0
libtpu: 0.0.40
codegen_flags: <defaults>
</compile_context>

<pallas_src>
import jax
import jax.numpy as jnp
from jax.experimental import pallas as pl
from jax.experimental.pallas import tpu as pltpu


HIDDEN = 64
_LANE = 128


def _round_up(x, m):
    return ((x + m - 1) // m) * m


def critic_kernel(xT_ref, w1T_ref, b1_ref, w2_ref, b2_ref, o_ref):
    # xT : (Dp, TB)  -- batch on lanes
    # w1T: (Hp, Dp)
    # b1 : (Hp, 1)   -- broadcast across lanes
    # w2 : (Hp, 1)   -- broadcast across lanes
    # b2 : (1, 1)    -- SMEM scalar
    # o  : (1, TB)   -- lane-dense output row
    hT = jnp.dot(w1T_ref[...], xT_ref[...], preferred_element_type=jnp.float32)
    hT = jnp.maximum(hT + b1_ref[...], 0.0)                     # bias + ReLU on VPU
    # Second "linear" layer as a VPU multiply + sublane reduction (N=1 matmul
    # would waste the entire MXU tile).
    out = jnp.sum(hT * w2_ref[...], axis=0, keepdims=True) + b2_ref[0, 0]
    o_ref[...] = out.astype(o_ref.dtype)


def critic_forward(state, w1, b1, w2, b2, *, batch_tile=512):
    """state: (B, D) f32; w1: (D, H); b1: (H,); w2: (H, 1); b2: (1,). Returns (B, 1)."""
    B, D = state.shape
    H = w1.shape[1]
    f32 = jnp.float32

    Hp = _round_up(H, _LANE)
    Dp = _round_up(D, _LANE)
    tb = min(_round_up(batch_tile, _LANE), _round_up(B, _LANE))
    B_pad = _round_up(B, tb)

    # Layout plumbing (pad + transpose) done once outside the kernel.
    xT = jnp.zeros((Dp, B_pad), f32).at[:D, :B].set(state.T.astype(f32))
    w1T = jnp.zeros((Hp, Dp), f32).at[:H, :D].set(w1.T.astype(f32))
    b1c = jnp.zeros((Hp, 1), f32).at[:H, 0].set(b1.astype(f32))
    w2c = jnp.zeros((Hp, 1), f32).at[:H, :].set(jnp.reshape(w2.astype(f32), (H, 1)))
    b2s = jnp.reshape(jnp.asarray(b2, f32), (1, 1))

    grid = (B_pad // tb,)
    cost = pl.CostEstimate(
        flops=2 * B_pad * Dp * Hp + 4 * B_pad * Hp,
        transcendentals=0,
        bytes_accessed=4 * (Dp * B_pad + Hp * Dp + 2 * Hp + B_pad + 1),
    )

    out = pl.pallas_call(
        critic_kernel,
        out_shape=jax.ShapeDtypeStruct((1, B_pad), f32),
        grid=grid,
        in_specs=[
            pl.BlockSpec((Dp, tb), lambda i: (0, i)),      # x tile (double-buffered)
            pl.BlockSpec((Hp, Dp), lambda i: (0, 0)),      # w1T resident
            pl.BlockSpec((Hp, 1), lambda i: (0, 0)),       # b1 column resident
            pl.BlockSpec((Hp, 1), lambda i: (0, 0)),       # w2 column resident
            pl.BlockSpec(memory_space=pltpu.MemorySpace.SMEM),  # b2 scalar in SMEM
        ],
        out_specs=pl.BlockSpec((1, tb), lambda i: (0, i)),
        compiler_params=pltpu.CompilerParams(
            dimension_semantics=("parallel",),             # shard batch across TCs (v7x)
        ),
        cost_estimate=cost,
    )(xT, w1T, b1c, w2c, b2s)

    return out[0, :B].reshape(B, 1)


def init_critic_params(key, input_size, hidden=HIDDEN):
    # Deterministic init mimicking torch.nn.Linear's U(-1/sqrt(fan_in), 1/sqrt(fan_in)).
    k1, k2, k3, k4 = jax.random.split(key, 4)
    bound1 = 1.0 / jnp.sqrt(jnp.float32(input_size))
    bound2 = 1.0 / jnp.sqrt(jnp.float32(hidden))
    w1 = jax.random.uniform(k1, (input_size, hidden), jnp.float32, -bound1, bound1)
    b1 = jax.random.uniform(k2, (hidden,), jnp.float32, -bound1, bound1)
    w2 = jax.random.uniform(k3, (hidden, 1), jnp.float32, -bound2, bound2)
    b2 = jax.random.uniform(k4, (1,), jnp.float32, -bound2, bound2)
    return w1, b1, w2, b2


if __name__ == "__main__":
    key = jax.random.PRNGKey(0)
    k_params, k_state = jax.random.split(key)

    batch, input_size = 8, 32
    w1, b1, w2, b2 = init_critic_params(k_params, input_size)
    state = jax.random.normal(k_state, (batch, input_size), jnp.float32)

    out = jax.jit(critic_forward)(state, w1, b1, w2, b2)
    jax.block_until_ready(out)

    # Reference check (plain JAX) to validate semantics.
    ref = jnp.maximum(state @ w1 + b1[None, :], 0.0) @ w2 + b2
    assert out.shape == (batch, 1)
    assert jnp.allclose(out, ref, atol=1e-5, rtol=1e-5), float(jnp.max(jnp.abs(out - ref)))

    print("KERNEL_OK")
</pallas_src>

<mosaic_0001>
module attributes {stable_mosaic.version = 11 : i64} {
  func.func @critic_kernel(%arg0: i32, %arg1: memref<128x128xf32, #tpu.memory_space<vmem>>, %arg2: memref<128x128xf32, #tpu.memory_space<vmem>>, %arg3: memref<128x1xf32, #tpu.memory_space<vmem>>, %arg4: memref<128x1xf32, #tpu.memory_space<vmem>>, %arg5: memref<1x1xf32, #tpu.memory_space<smem>>, %arg6: memref<1x128xf32, #tpu.memory_space<vmem>>) attributes {dimension_semantics = [#tpu.dimension_semantics<parallel>], iteration_bounds = array<i64: 1>, scalar_prefetch = 0 : i64, scratch_operands = 0 : i64, tpu.core_type = #tpu.core_type<tc>, window_params = [{transform_indices = @transform_0, window_bounds = array<i64: 128, 128>}, {pipeline_mode = #tpu.pipeline_mode<synchronous>, transform_indices = @transform_1, window_bounds = array<i64: 128, 128>}, {pipeline_mode = #tpu.pipeline_mode<synchronous>, transform_indices = @transform_2, window_bounds = array<i64: 128, 1>}, {pipeline_mode = #tpu.pipeline_mode<synchronous>, transform_indices = @transform_3, window_bounds = array<i64: 128, 1>}, {transform_indices = @transform_4, window_bounds = array<i64: 1, 1>}, {transform_indices = @transform_5, window_bounds = array<i64: 1, 128>}]} {
    %c0 = arith.constant 0 : index
    %c0_0 = arith.constant 0 : index
    %0 = vector.load %arg2[%c0, %c0_0] : memref<128x128xf32, #tpu.memory_space<vmem>>, vector<128x128xf32>
    %c0_1 = arith.constant 0 : index
    %c0_2 = arith.constant 0 : index
    %1 = vector.load %arg1[%c0_1, %c0_2] : memref<128x128xf32, #tpu.memory_space<vmem>>, vector<128x128xf32>
    %cst = arith.constant dense<0.000000e+00> : vector<128x128xf32>
    %2 = tpu.matmul %0, %1, %cst {dimension_numbers = #tpu.dot_dimension_numbers<[1], [0], [0], [1], [0, 0, 1, 1], [], []>} : vector<128x128xf32>, vector<128x128xf32>, vector<128x128xf32> -> vector<128x128xf32>
    %c0_3 = arith.constant 0 : index
    %c0_4 = arith.constant 0 : index
    %3 = vector.load %arg3[%c0_3, %c0_4] : memref<128x1xf32, #tpu.memory_space<vmem>>, vector<128x1xf32>
    %4 = vector.broadcast %3 : vector<128x1xf32> to vector<128x128xf32>
    %5 = arith.addf %2, %4 : vector<128x128xf32>
    %cst_5 = arith.constant 0.000000e+00 : f32
    %6 = vector.broadcast %cst_5 : f32 to vector<128x128xf32>
    %7 = arith.maximumf %5, %6 : vector<128x128xf32>
    %c0_6 = arith.constant 0 : index
    %c0_7 = arith.constant 0 : index
    %8 = vector.load %arg4[%c0_6, %c0_7] : memref<128x1xf32, #tpu.memory_space<vmem>>, vector<128x1xf32>
    %9 = vector.broadcast %8 : vector<128x1xf32> to vector<128x128xf32>
    %10 = arith.mulf %7, %9 : vector<128x128xf32>
    %cst_8 = arith.constant dense<0.000000e+00> : vector<128xf32>
    %11 = vector.multi_reduction <add>, %10, %cst_8 [0] : vector<128x128xf32> to vector<128xf32>
    %12 = vector.shape_cast %11 : vector<128xf32> to vector<1x128xf32>
    %c0_9 = arith.constant 0 : index
    %c0_10 = arith.constant 0 : index
    %13 = memref.load %arg5[%c0_9, %c0_10] : memref<1x1xf32, #tpu.memory_space<smem>>
    %14 = vector.broadcast %13 : f32 to vector<1x128xf32>
    %15 = arith.addf %12, %14 : vector<1x128xf32>
    %c0_11 = arith.constant 0 : index
    %c0_12 = arith.constant 0 : index
    %16 = vector.load %arg6[%c0_11, %c0_12] : memref<1x128xf32, #tpu.memory_space<vmem>>, vector<1x128xf32>
    tpu.vector_store %arg6[%c0_11, %c0_12], %15 {strides = array<i32>} : memref<1x128xf32, #tpu.memory_space<vmem>>, vector<1x128xf32>,
    return
  }
  func.func @transform_0(%arg0: i32) -> (i32, i32) {
    %c0_i32 = arith.constant 0 : i32
    %c0_i32_0 = arith.constant 0 : i32
    return %c0_i32, %arg0 : i32, i32
  }
  func.func @transform_1(%arg0: i32) -> (i32, i32) {
    %c0_i32 = arith.constant 0 : i32
    %c0_i32_0 = arith.constant 0 : i32
    %c0_i32_1 = arith.constant 0 : i32
    return %c0_i32, %c0_i32_0 : i32, i32
  }
  func.func @transform_2(%arg0: i32) -> (i32, i32) {
    %c0_i32 = arith.constant 0 : i32
    %c0_i32_0 = arith.constant 0 : i32
    %c0_i32_1 = arith.constant 0 : i32
    return %c0_i32, %c0_i32_0 : i32, i32
  }
  func.func @transform_3(%arg0: i32) -> (i32, i32) {
    %c0_i32 = arith.constant 0 : i32
    %c0_i32_0 = arith.constant 0 : i32
    %c0_i32_1 = arith.constant 0 : i32
    return %c0_i32, %c0_i32_0 : i32, i32
  }
  func.func @transform_4(%arg0: i32) -> (i32, i32) {
    %c0_i32 = arith.constant 0 : i32
    %c0_i32_0 = arith.constant 0 : i32
    %c0_i32_1 = arith.constant 0 : i32
    return %c0_i32, %c0_i32_0 : i32, i32
  }
  func.func @transform_5(%arg0: i32) -> (i32, i32) {
    %c0_i32 = arith.constant 0 : i32
    %c0_i32_0 = arith.constant 0 : i32
    return %c0_i32, %arg0 : i32, i32
  }
}

</mosaic_0001>

<bundles_post_ra>
// kernel: critic_forward.1
= control target key start
LH: loop header
LB: loop body
LE: loop exit
PB: predicated region body
PF: predicated region fallthrough
CT: control target
= control target key end

     0   :  { %v423_v0 = vmov 0   ;;  %s667_s2 = inlined_call_operand.vmem [shape: f32[128,1], index: 2, kind: input, shape index: {}]   ;;  %s668_s0 = inlined_call_operand.vmem [shape: f32[128,128], index: 0, kind: input, shape index: {}]   ;;  %s669_s1 = inlined_call_operand.vmem [shape: f32[128,128], index: 1, kind: input, shape index: {}]   ;;  %s670_s3 = inlined_call_operand.vmem [shape: f32[128,1], index: 3, kind: input, shape index: {}]   ;;  %s671_s4 = inlined_call_operand.<no memory space> [shape: f32[1,1], index: 4, kind: input, shape index: {}]   ;;  %s672_s5 = inlined_call_operand.vmem [shape: f32[1,128], index: 5, kind: output, shape index: {}]  }
   0x1   :  { %422 = vset.pattern.permute.xlu2 %v423_v0  ;;  %421 = vset.pattern.permute.xlu1 %v423_v0  ;;  %v57_v1 = vld [vmem:[%s667_s2 + $0x20] sm:$0xff]  ;;  %v55_v2 = vld [vmem:[%s667_s2 + $0x10] sm:$0xff]  ;;  %v52_v4 = vld [vmem:[%s668_s0 + $0x78] sm:$0xff] }
   0x2   :  { %v53_v3 = vld [vmem:[%s667_s2] sm:$0xff]  ;;  %420 = vset.pattern.permute.xlu0 %v423_v0  ;;  %91 = vperm.xlu2 %422, %v57_v1   ;;  %v51_v5 = vld [vmem:[%s668_s0 + $0x70] sm:$0xff]  ;;  %v50_v6 = vld [vmem:[%s668_s0 + $0x68] sm:$0xff] }
   0x3   :  { %81 = vperm.xlu1 %421, %v55_v2   ;;  %71 = vperm.xlu0 %420, %v53_v3   ;;  %v49_v7 = vld [vmem:[%s668_s0 + $0x60] sm:$0xff]  ;;  %v58_v8 = vld [vmem:[%s667_s2 + $0x28] sm:$0xff]  ;;  %v56_v9 = vld [vmem:[%s667_s2 + $0x18] sm:$0xff] }
   0x4   :  { %149 = vmatpush.msra.mxu0 %v52_v4  ;;  %371 = vmatpush.msra.mxu1 %v52_v4  ;;  %v54_v10 = vld [vmem:[%s667_s2 + $0x8] sm:$0xff]  ;;  %v48_v11 = vld [vmem:[%s668_s0 + $0x58] sm:$0xff]  ;;  %v47_v12 = vld [vmem:[%s668_s0 + $0x50] sm:$0xff] }
   0x5   :  { %372 = vmatpush.msra.mxu2 %v52_v4  ;;  %373 = vmatpush.msra.mxu3 %v52_v4  ;;  %v46_v13 = vld [vmem:[%s668_s0 + $0x48] sm:$0xff]  ;;  %v45_v14 = vld [vmem:[%s668_s0 + $0x40] sm:$0xff]  ;;  %v60_v16 = vld [vmem:[%s667_s2 + $0x38] sm:$0xff] }
   0x6   :  { %150 = vmatpush.msra.mxu0 %v51_v5  ;;  %374 = vmatpush.msra.mxu1 %v51_v5  ;;  %v61_v15 = vld [vmem:[%s667_s2 + $0x40] sm:$0xff]  ;;  %v59_v17 = vld [vmem:[%s667_s2 + $0x30] sm:$0xff]  ;;  %v44_v18 = vld [vmem:[%s668_s0 + $0x38] sm:$0xff] }
   0x7   :  { %375 = vmatpush.msra.mxu2 %v51_v5  ;;  %376 = vmatpush.msra.mxu3 %v51_v5  ;;  %v43_v19 = vld [vmem:[%s668_s0 + $0x30] sm:$0xff]  ;;  %v42_v20 = vld [vmem:[%s668_s0 + $0x28] sm:$0xff]  ;;  %v41_v21 = vld [vmem:[%s668_s0 + $0x20] sm:$0xff] }
   0x8   :  { %151 = vmatpush.msra.mxu0 %v50_v6  ;;  %377 = vmatpush.msra.mxu1 %v50_v6  ;;  %v64_v22 = vld [vmem:[%s667_s2 + $0x58] sm:$0xff]  ;;  %v63_v23 = vld [vmem:[%s667_s2 + $0x50] sm:$0xff]  ;;  %v62_v24 = vld [vmem:[%s667_s2 + $0x48] sm:$0xff] }
   0x9   :  { %378 = vmatpush.msra.mxu2 %v50_v6  ;;  %379 = vmatpush.msra.mxu3 %v50_v6  ;;  %v40_v25 = vld [vmem:[%s668_s0 + $0x18] sm:$0xff]  ;;  %v39_v26 = vld [vmem:[%s668_s0 + $0x10] sm:$0xff]  ;;  %v38_v27 = vld [vmem:[%s668_s0 + $0x8] sm:$0xff] }
   0xa   :  { %152 = vmatpush.msra.mxu0 %v49_v7  ;;  %380 = vmatpush.msra.mxu1 %v49_v7  ;;  %v37_v28 = vld [vmem:[%s668_s0] sm:$0xff]  ;;  %v67_v33 = vld [vmem:[%s667_s2 + $0x70] sm:$0xff]  ;;  %v66_v34 = vld [vmem:[%s667_s2 + $0x68] sm:$0xff] }
   0xb   :  { %381 = vmatpush.msra.mxu2 %v49_v7  ;;  %382 = vmatpush.msra.mxu3 %v49_v7  ;;  %v21_v29 = vld [vmem:[%s669_s1] sm:$0xff]  ;;  %v22_v36 = vld [vmem:[%s669_s1 + $0x8] sm:$0xff]  ;;  %v68_v42 = vld [vmem:[%s667_s2 + $0x78] sm:$0xff] }
   0xc   :  { %96 = vperm.xlu2 %422, %v58_v8   ;;  %86 = vperm.xlu1 %421, %v56_v9   ;;  %v25_v30 = vld [vmem:[%s669_s1 + $0x20] sm:$0xff]  ;;  %v26_v37 = vld [vmem:[%s669_s1 + $0x28] sm:$0xff]  ;;  %v23_v43 = vld [vmem:[%s669_s1 + $0x10] sm:$0xff] }
   0xd   :  { %76 = vperm.xlu0 %420, %v54_v10   ;;  %153 = vmatpush.msra.mxu0 %v48_v11  ;;  %v29_v31 = vld [vmem:[%s669_s1 + $0x40] sm:$0xff]  ;;  %v30_v38 = vld [vmem:[%s669_s1 + $0x48] sm:$0xff]  ;;  %v27_v44 = vld [vmem:[%s669_s1 + $0x30] sm:$0xff] }
   0xe   :  { %383 = vmatpush.msra.mxu1 %v48_v11  ;;  %384 = vmatpush.msra.mxu2 %v48_v11  ;;  %v33_v32 = vld [vmem:[%s669_s1 + $0x60] sm:$0xff]  ;;  %v34_v39 = vld [vmem:[%s669_s1 + $0x68] sm:$0xff]  ;;  %v31_v45 = vld [vmem:[%s669_s1 + $0x50] sm:$0xff] }
   0xf   :  { %385 = vmatpush.msra.mxu3 %v48_v11  ;;  %154 = vmatpush.msra.mxu0 %v47_v12  ;;  %v65_v35 = vld [vmem:[%s667_s2 + $0x60] sm:$0xff]  ;;  %v231_v40 = vld [vmem:[%s670_s3 + $0x8] sm:$0xff]  ;;  %v35_v46 = vld [vmem:[%s669_s1 + $0x70] sm:$0xff] }
  0x10   :  { %386 = vmatpush.msra.mxu1 %v47_v12  ;;  %387 = vmatpush.msra.mxu2 %v47_v12  ;;  %v230_v41 = vld [vmem:[%s670_s3] sm:$0xff]  ;;  %v233_v48 = vld [vmem:[%s670_s3 + $0x18] sm:$0xff]  ;;  %v232_v49 = vld [vmem:[%s670_s3 + $0x10] sm:$0xff] }
  0x11   :  { %388 = vmatpush.msra.mxu3 %v47_v12  ;;  %155 = vmatpush.msra.mxu0 %v46_v13  ;;  %v234_v47 = vld [vmem:[%s670_s3 + $0x20] sm:$0xff]  ;;  %v24_v50 = vld [vmem:[%s669_s1 + $0x18] sm:$0xff]  ;;  %v236_v55 = vld [vmem:[%s670_s3 + $0x30] sm:$0xff] }
  0x12   :  { %389 = vmatpush.msra.mxu1 %v46_v13  ;;  %390 = vmatpush.msra.mxu2 %v46_v13  ;;  %v28_v51 = vld [vmem:[%s669_s1 + $0x38] sm:$0xff]  ;;  %v235_v56 = vld [vmem:[%s670_s3 + $0x28] sm:$0xff]  ;;  %v240_v57 = vld [vmem:[%s670_s3 + $0x50] sm:$0xff] }
  0x13   :  { %391 = vmatpush.msra.mxu3 %v46_v13  ;;  %156 = vmatpush.msra.mxu0 %v45_v14  ;;  %v32_v52 = vld [vmem:[%s669_s1 + $0x58] sm:$0xff]  ;;  %v239_v58 = vld [vmem:[%s670_s3 + $0x48] sm:$0xff]  ;;  %v238_v59 = vld [vmem:[%s670_s3 + $0x40] sm:$0xff] }
  0x14   :  { %392 = vmatpush.msra.mxu1 %v45_v14  ;;  %393 = vmatpush.msra.mxu2 %v45_v14  ;;  %v36_v53 = vld [vmem:[%s669_s1 + $0x78] sm:$0xff]  ;;  %v243_v60 = vld [vmem:[%s670_s3 + $0x68] sm:$0xff]  ;;  %v242_v61 = vld [vmem:[%s670_s3 + $0x60] sm:$0xff] }
  0x15   :  { %394 = vmatpush.msra.mxu3 %v45_v14  ;;  %111 = vperm.xlu2 %422, %v61_v15   ;;  %v237_v54 = vld [vmem:[%s670_s3 + $0x38] sm:$0xff]  ;;  %v244_v0 = vld [vmem:[%s670_s3 + $0x70] sm:$0xff] }
  0x16   :  { %106 = vperm.xlu1 %421, %v60_v16   ;;  %101 = vperm.xlu0 %420, %v59_v17   ;;  %v241_v62 = vld [vmem:[%s670_s3 + $0x58] sm:$0xff] }
  0x17   :  { %157 = vmatpush.msra.mxu0 %v44_v18  ;;  %395 = vmatpush.msra.mxu1 %v44_v18  ;;  %v245_v63 = vld [vmem:[%s670_s3 + $0x78] sm:$0xff] }
  0x18   :  { %396 = vmatpush.msra.mxu2 %v44_v18  ;;  %397 = vmatpush.msra.mxu3 %v44_v18 }
  0x19   :  { %158 = vmatpush.msra.mxu0 %v43_v19  ;;  %398 = vmatpush.msra.mxu1 %v43_v19 }
  0x1a   :  { %399 = vmatpush.msra.mxu2 %v43_v19  ;;  %400 = vmatpush.msra.mxu3 %v43_v19 }
  0x1b   :  { %159 = vmatpush.msra.mxu0 %v42_v20  ;;  %401 = vmatpush.msra.mxu1 %v42_v20 }
  0x1c   :  { %402 = vmatpush.msra.mxu2 %v42_v20  ;;  %403 = vmatpush.msra.mxu3 %v42_v20 }
  0x1d   :  { %160 = vmatpush.msra.mxu0 %v41_v21  ;;  %404 = vmatpush.msra.mxu1 %v41_v21 }
  0x1e   :  { %405 = vmatpush.msra.mxu2 %v41_v21  ;;  %406 = vmatpush.msra.mxu3 %v41_v21 }
  0x1f   :  { %126 = vperm.xlu2 %422, %v64_v22   ;;  %121 = vperm.xlu1 %421, %v63_v23  }
  0x20   :  { %116 = vperm.xlu0 %420, %v62_v24   ;;  %161 = vmatpush.msra.mxu0 %v40_v25 }
  0x21   :  { %407 = vmatpush.msra.mxu1 %v40_v25  ;;  %408 = vmatpush.msra.mxu2 %v40_v25 }
  0x22   :  { %409 = vmatpush.msra.mxu3 %v40_v25  ;;  %162 = vmatpush.msra.mxu0 %v39_v26 }
  0x23   :  { %410 = vmatpush.msra.mxu1 %v39_v26  ;;  %411 = vmatpush.msra.mxu2 %v39_v26 }
  0x24   :  { %412 = vmatpush.msra.mxu3 %v39_v26  ;;  %163 = vmatpush.msra.mxu0 %v38_v27 }
  0x25   :  { %413 = vmatpush.msra.mxu1 %v38_v27  ;;  %414 = vmatpush.msra.mxu2 %v38_v27 }
  0x26   :  { %415 = vmatpush.msra.mxu3 %v38_v27  ;;  %164 = vmatpush.msra.mxu0 %v37_v28 }
  0x27   :  { %416 = vmatpush.msra.mxu1 %v37_v28  ;;  %417 = vmatpush.msra.mxu2 %v37_v28 }
  0x28   :  { %418 = vmatpush.msra.mxu3 %v37_v28  ;;  %165 = vmatmul.f32.vlgmr.msra.gmra.mxu0 %v21_v29 }
  0x29   :  { %177 = vmatmul.f32.vlgmr.msra.gmra.mxu1 %v25_v30  ;;  %189 = vmatmul.f32.vlgmr.msra.gmra.mxu2 %v29_v31 }
  0x2a   :  { %201 = vmatmul.f32.vlgmr.msra.gmra.mxu3 %v33_v32  ;;  %141 = vperm.xlu2 %422, %v67_v33  }
  0x2b   :  { %136 = vperm.xlu1 %421, %v66_v34   ;;  %131 = vperm.xlu0 %420, %v65_v35  }
  0x30   :  { %168 = vmatmul.f32.gmra.mxu0 %v22_v36 }
  0x31   :  { %180 = vmatmul.f32.gmra.mxu1 %v26_v37  ;;  %192 = vmatmul.f32.gmra.mxu2 %v30_v38 }
  0x32   :  { %204 = vmatmul.f32.gmra.mxu3 %v34_v39  ;;  %253 = vperm.xlu2 %422, %v231_v40  }
  0x33   :  { %248 = vperm.xlu1 %421, %v230_v41   ;;  %146 = vperm.xlu0 %420, %v68_v42  }
  0x38   :  { %171 = vmatmul.f32.gmra.mxu0 %v23_v43 }
  0x39   :  { %183 = vmatmul.f32.gmra.mxu1 %v27_v44  ;;  %195 = vmatmul.f32.gmra.mxu2 %v31_v45 }
  0x3a   :  { %207 = vmatmul.f32.gmra.mxu3 %v35_v46  ;;  %268 = vperm.xlu2 %422, %v234_v47  }
  0x3b   :  { %263 = vperm.xlu1 %421, %v233_v48   ;;  %258 = vperm.xlu0 %420, %v232_v49  }
  0x40   :  { %174 = vmatmul.f32.gmra.mxu0 %v24_v50 }
  0x41   :  { %186 = vmatmul.f32.gmra.mxu1 %v28_v51  ;;  %198 = vmatmul.f32.gmra.mxu2 %v32_v52 }
  0x42   :  { %210 = vmatmul.f32.gmra.mxu3 %v36_v53  ;;  %283 = vperm.xlu2 %422, %v237_v54  }
  0x43   :  { %278 = vperm.xlu1 %421, %v236_v55   ;;  %273 = vperm.xlu0 %420, %v235_v56  }
  0x4a   :  { %298 = vperm.xlu2 %422, %v240_v57  }
  0x4b   :  { %293 = vperm.xlu1 %421, %v239_v58   ;;  %288 = vperm.xlu0 %420, %v238_v59  }
  0x52   :  { %313 = vperm.xlu2 %422, %v243_v60  }
  0x53   :  { %308 = vperm.xlu1 %421, %v242_v61   ;;  %303 = vperm.xlu0 %420, %v241_v62  }
  0x5b   :  { %323 = vperm.xlu1 %421, %v245_v63   ;;  %318 = vperm.xlu0 %420, %v244_v0  }
  0x5c   :  { %v92_v3 = vpop.permute.xlu2 %91 }
  0x66   :  { %v97_v6 = vpop.permute.xlu2 %96 }
  0x6f   :  { %v112_v9 = vpop.permute.xlu2 %111 }
  0x75   :  { %v82_v1 = vpop.permute.xlu1 %81  ;;  %v72_v2 = vpop.permute.xlu0 %71 }
  0x79   :  { %v646_v12 = vpop.permute.xlu2 %126 }
  0x7e   :  { %v87_v4 = vpop.permute.xlu1 %86 }
  0x7f   :  { %v77_v5 = vpop.permute.xlu0 %76 }
  0x84   :  { %v652_v15 = vpop.permute.xlu2 %141 }
  0x88   :  { %v107_v7 = vpop.permute.xlu1 %106  ;;  %v102_v8 = vpop.permute.xlu0 %101 }
  0x8c   :  { %v254_v21 = vpop.permute.xlu2 %253 }
  0x91   :  { %v122_v10 = vpop.permute.xlu1 %121 }
  0x92   :  { %v117_v11 = vpop.permute.xlu0 %116 }
  0x94   :  { %v269_v33 = vpop.permute.xlu2 %268 }
  0x9c   :  { %v284_v53 = vpop.permute.xlu2 %283 }
  0x9d   :  { %v648_v13 = vpop.permute.xlu1 %136  ;;  %v650_v14 = vpop.permute.xlu0 %131 }
  0xa5   :  { %v249_v16 = vpop.permute.xlu1 %248  ;;  %v654_v17 = vpop.permute.xlu0 %146 }
  0xa6   :  { %v166_v18 = vpop.f32.mrf.mxu0  ;;  %v178_v19 = vpop.f32.mrf.mxu1 }
  0xa7   :  { %v167_v30 = vadd.f32 %v166_v18, %v72_v2  ;;  %v179_v39 = vadd.f32 %v178_v19, %v92_v3 }
  0xa9   :  { %v214_v37 = vmax.f32 %v167_v30, 0.0  ;;  %v218_v47 = vmax.f32 %v179_v39, 0.0 }
  0xab   :  { %v326_v44 = vmul.f32 %v249_v16, %v214_v37  ;;  %v330_v59 = vmul.f32 %v269_v33, %v218_v47 }
  0xac   :  { %v190_v20 = vpop.f32.mrf.mxu2 }
  0xad   :  { %v259_v22 = vpop.permute.xlu0 %258  ;;  %v264_v25 = vpop.permute.xlu1 %263  ;;  %v191_v63 = vadd.f32 %v190_v20, %v112_v9 }
  0xae   :  { %v169_v23 = vpop.f32.mrf.mxu0  ;;  %v181_v24 = vpop.f32.mrf.mxu1 }
  0xaf   :  { %v202_v26 = vpop.f32.mrf.mxu3  ;;  %v170_v28 = vadd.f32 %v169_v23, %v77_v5  ;;  %v182_v50 = vadd.f32 %v181_v24, %v97_v6  ;;  %v222_v18 = vmax.f32 %v191_v63, 0.0 }
  0xb0   :  { %v203_v20 = vadd.f32 %v202_v26, %v650_v14 }
  0xb1   :  { %v215_v35 = vmax.f32 %v170_v28, 0.0  ;;  %v219_v60 = vmax.f32 %v182_v50, 0.0 }
  0xb2   :  { %v226_v33 = vmax.f32 %v203_v20, 0.0 }
  0xb3   :  { %v327_v40 = vmul.f32 %v254_v21, %v215_v35 }
  0xb4   :  { %v193_v27 = vpop.f32.mrf.mxu2 }
  0xb5   :  { %v274_v34 = vpop.permute.xlu0 %273  ;;  %v279_v36 = vpop.permute.xlu1 %278  ;;  %v342_v49 = vadd.f32 %v327_v40, %v326_v44  ;;  %v194_v5 = vadd.f32 %v193_v27, %v117_v11 }
  0xb6   :  { %v172_v29 = vpop.f32.mrf.mxu0  ;;  %v184_v32 = vpop.f32.mrf.mxu1  ;;  %v331_v0 = vmul.f32 %v274_v34, %v219_v60 }
  0xb7   :  { %v173_v31 = vadd.f32 %v172_v29, %v82_v1  ;;  %v205_v41 = vpop.f32.mrf.mxu3  ;;  %v185_v51 = vadd.f32 %v184_v32, %v102_v8  ;;  %v223_v24 = vmax.f32 %v194_v5, 0.0 }
  0xb8   :  { %v206_v30 = vadd.f32 %v205_v41, %v648_v13 }
  0xb9   :  { %v216_v38 = vmax.f32 %v173_v31, 0.0  ;;  %v220_v61 = vmax.f32 %v185_v51, 0.0 }
  0xba   :  { %v227_v35 = vmax.f32 %v206_v30, 0.0 }
  0xbb   :  { %v328_v45 = vmul.f32 %v259_v22, %v216_v38  ;;  %v332_v6 = vmul.f32 %v279_v36, %v220_v61  ;;  %v299_v22 = vpop.permute.xlu2 %298 }
  0xbc   :  { %v196_v42 = vpop.f32.mrf.mxu2 }
  0xbd   :  { %v289_v54 = vpop.permute.xlu0 %288  ;;  %v343_v55 = vadd.f32 %v342_v49, %v328_v45  ;;  %v294_v58 = vpop.permute.xlu1 %293  ;;  %v197_v8 = vadd.f32 %v196_v42, %v122_v10 }
  0xbe   :  { %v175_v43 = vpop.f32.mrf.mxu0  ;;  %v187_v48 = vpop.f32.mrf.mxu1  ;;  %v335_v11 = vmul.f32 %v294_v58, %v223_v24 }
  0xbf   :  { %v176_v46 = vadd.f32 %v175_v43, %v87_v4  ;;  %v188_v57 = vadd.f32 %v187_v48, %v107_v7  ;;  %v208_v3 = vpop.f32.mrf.mxu3  ;;  %v224_v28 = vmax.f32 %v197_v8, 0.0 }
  0xc1   :  { %v217_v52 = vmax.f32 %v176_v46, 0.0  ;;  %v221_v2 = vmax.f32 %v188_v57, 0.0  ;;  %v336_v31 = vmul.f32 %v299_v22, %v224_v28 }
  0xc3   :  { %v329_v56 = vmul.f32 %v264_v25, %v217_v52  ;;  %v333_v19 = vmul.f32 %v284_v53, %v221_v2  ;;  %v334_v25 = vmul.f32 %v289_v54, %v222_v18  ;;  %v314_v14 = vpop.permute.xlu2 %313 }
  0xc4   :  { %v199_v4 = vpop.f32.mrf.mxu2  ;;  %v339_v42 = vmul.f32 %v314_v14, %v227_v35 }
  0xc5   :  { %v344_v62 = vadd.f32 %v343_v55, %v329_v56  ;;  %v200_v7 = vadd.f32 %v199_v4, %v646_v12  ;;  %v304_v23 = vpop.permute.xlu0 %303  ;;  %v309_v29 = vpop.permute.xlu1 %308  ;;  %v209_v12 = vadd.f32 %v208_v3, %v652_v15 }
  0xc6   :  { %v338_v38 = vmul.f32 %v309_v29, %v226_v33 }
  0xc7   :  { %v345_v1 = vadd.f32 %v344_v62, %v330_v59  ;;  %v225_v10 = vmax.f32 %v200_v7, 0.0  ;;  %v211_v34 = vpop.f32.mrf.mxu3  ;;  %v228_v13 = vmax.f32 %v209_v12, 0.0 }
  0xc8   :  { %v212_v40 = vadd.f32 %v211_v34, %v654_v17  ;;  %v364_v17 = vstv %s671_s4 }
  0xc9   :  { %v346_v16 = vadd.f32 %v345_v1, %v331_v0  ;;  %v337_v36 = vmul.f32 %v304_v23, %v225_v10 }
  0xca   :  { %v229_v44 = vmax.f32 %v212_v40, 0.0 }
  0xcb   :  { %v347_v21 = vadd.f32 %v346_v16, %v332_v6 }
  0xcd   :  { %v348_v9 = vadd.f32 %v347_v21, %v333_v19  ;;  %v319_v26 = vpop.permute.xlu0 %318  ;;  %v324_v43 = vpop.permute.xlu1 %323 }
  0xce   :  { %v340_v45 = vmul.f32 %v319_v26, %v228_v13  ;;  %v341_v47 = vmul.f32 %v324_v43, %v229_v44 }
  0xcf   :  { %v349_v27 = vadd.f32 %v348_v9, %v334_v25 }
  0xd1   :  { %v350_v32 = vadd.f32 %v349_v27, %v335_v11 }
  0xd3   :  { %v351_v37 = vadd.f32 %v350_v32, %v336_v31 }
  0xd5   :  { %v352_v39 = vadd.f32 %v351_v37, %v337_v36 }
  0xd7   :  { %v353_v41 = vadd.f32 %v352_v39, %v338_v38 }
  0xd9   :  { %v354_v46 = vadd.f32 %v353_v41, %v339_v42 }
  0xdb   :  { %v355_v48 = vadd.f32 %v354_v46, %v340_v45 }
  0xdd   :  { %v356_v49 = vadd.f32 %v355_v48, %v341_v47 }
  0xdf   :  { %v357_v50 = vrot.slane %v356_v49, 4 }
  0xe1   :  { %v358_v15 = vadd.f32 %v357_v50, %v356_v49 }
  0xe3   :  { %v359_v51 = vrot.slane %v358_v15, 2 }
  0xe5   :  { %v360_v52 = vadd.f32 %v359_v51, %v358_v15 }
  0xe7   :  { %v361_v53 = vrot.slane %v360_v52, 1 }
  0xe9   :  { %v362_v54 = vadd.f32 %v361_v53, %v360_v52 }
  0xeb   :  { %v365_v55 = vadd.f32 %v364_v17, %v362_v54 }
  0xed   :  { %366 = vst [vmem:[%s672_s5] sm:$0x1] %v365_v55 }

</bundles_post_ra>
